<compile_context>
chip_gen: v6e
topology: v6e:2x2x1
jax: 0.10.0
libtpu: 0.0.40
codegen_flags: <defaults>
</compile_context>

<pallas_src>
import jax
import jax.numpy as jnp
from jax.experimental import pallas as pl
from jax.experimental.pallas import tpu as pltpu


def _model_kernel(x1_row0_ref, x1_col0_ref, x2_ref, out_ref):
    S = x2_ref.shape[-1]

    x1_row0 = x1_row0_ref[...]          # (B, S) == x1[:, 0, :]
    x1_col0 = x1_col0_ref[...]          # (B, S) == x1[:, :, 0]
    x2 = x2_ref[...]                    # (B, S, S)

    # A[b, m] = v1[b, 0, m] = sum_k x1[b, 0, k] * x2[b, m, k]
    #   (lane-axis reduction over k; whole-array VPU mul + XLU reduce)
    a = jnp.sum(x1_row0[:, None, :] * x2, axis=-1)       # (B, S)

    # D[m, b] = v2[m, b, 0] = sum_k x1[m, k, 0] * x2[m, k, b]
    #   (sublane-axis reduction over k; result indexed [m, b])
    d = jnp.sum(x1_col0[:, :, None] * x2, axis=1)        # (B, S), indexed [m, b]

    left = a * d.T                       # left[b, m] = A[b, m] * D[m, b]
    right = x2[:, :, 0]                  # cat(..., x2)[..., 0] part

    # Two direct stores; no concatenated temporary.
    out_ref[:, 0:S] = left
    out_ref[:, S:2 * S] = right


def model_forward(x1, x2):
    B, S, S2 = x1.shape
    assert x1.shape == x2.shape and S == S2 and B == S, (
        "forward requires cubic batched inputs (B == M == N) for the "
        "broadcast/cat in the reference model to be well defined")

    # Slice x1 in the wrapper: the kernel only ever needs row 0 and column 0
    # of each batch, so don't DMA the full (B, S, S) x1 into VMEM.
    x1_row0 = x1[:, 0, :]                # (B, S)
    x1_col0 = x1[:, :, 0]                # (B, S)

    out_shape = jax.ShapeDtypeStruct((B, 2 * S), jnp.float32)

    return pl.pallas_call(
        _model_kernel,
        out_shape=out_shape,
        grid=(1,),
        in_specs=[
            pl.BlockSpec((B, S), lambda i: (0, 0)),        # x1_row0
            pl.BlockSpec((B, S), lambda i: (0, 0)),        # x1_col0
            pl.BlockSpec((B, S, S), lambda i: (0, 0, 0)),  # x2
        ],
        out_specs=pl.BlockSpec((B, 2 * S), lambda i: (0, 0)),
        compiler_params=pltpu.CompilerParams(
            dimension_semantics=("arbitrary",)),
    )(x1_row0, x1_col0, x2)


if __name__ == "__main__":
    B = S = 8
    key = jax.random.PRNGKey(0)
    k1, k2 = jax.random.split(key)
    x1 = jax.random.normal(k1, (B, S, S), dtype=jnp.float32)
    x2 = jax.random.normal(k2, (B, S, S), dtype=jnp.float32)

    out = model_forward(x1, x2)
    jax.block_until_ready(out)

    # pure-JAX reference of the PyTorch forward (X1 -> x1, X2 -> x2)
    v0 = jnp.transpose(x2, (0, 2, 1))
    v1 = jnp.matmul(x1, v0)
    v2 = jnp.matmul(v0, x1)
    v3 = jnp.transpose(v1 * jnp.transpose(v2, (1, 2, 0)), (0, 2, 1))
    ref = jnp.concatenate([v3, x2], axis=1)[..., 0]

    assert out.shape == (B, 2 * S), out.shape
    assert jnp.allclose(out, ref, atol=1e-5, rtol=1e-5), "mismatch vs reference"
    print("KERNEL_OK")
</pallas_src>

<mosaic_0001>
module attributes {stable_mosaic.version = 11 : i64} {
  func.func @_model_kernel(%arg0: i32, %arg1: memref<8x8xf32, #tpu.memory_space<vmem>>, %arg2: memref<8x8xf32, #tpu.memory_space<vmem>>, %arg3: memref<8x8x8xf32, #tpu.memory_space<vmem>>, %arg4: memref<8x16xf32, #tpu.memory_space<vmem>>) attributes {dimension_semantics = [#tpu.dimension_semantics<arbitrary>], iteration_bounds = array<i64: 1>, scalar_prefetch = 0 : i64, scratch_operands = 0 : i64, tpu.core_type = #tpu.core_type<tc>, window_params = [{pipeline_mode = #tpu.pipeline_mode<synchronous>, transform_indices = @transform_0, window_bounds = array<i64: 8, 8>}, {pipeline_mode = #tpu.pipeline_mode<synchronous>, transform_indices = @transform_1, window_bounds = array<i64: 8, 8>}, {pipeline_mode = #tpu.pipeline_mode<synchronous>, transform_indices = @transform_2, window_bounds = array<i64: 8, 8, 8>}, {pipeline_mode = #tpu.pipeline_mode<synchronous>, transform_indices = @transform_3, window_bounds = array<i64: 8, 16>}]} {
    %c0 = arith.constant 0 : index
    %c0_0 = arith.constant 0 : index
    %0 = vector.load %arg1[%c0, %c0_0] : memref<8x8xf32, #tpu.memory_space<vmem>>, vector<8x8xf32>
    %c0_1 = arith.constant 0 : index
    %c0_2 = arith.constant 0 : index
    %1 = vector.load %arg2[%c0_1, %c0_2] : memref<8x8xf32, #tpu.memory_space<vmem>>, vector<8x8xf32>
    %c0_3 = arith.constant 0 : index
    %c0_4 = arith.constant 0 : index
    %c0_5 = arith.constant 0 : index
    %2 = vector.load %arg3[%c0_3, %c0_4, %c0_5] : memref<8x8x8xf32, #tpu.memory_space<vmem>>, vector<8x8x8xf32>
    %3 = vector.shape_cast %0 : vector<8x8xf32> to vector<8x1x8xf32>
    %4 = vector.broadcast %3 : vector<8x1x8xf32> to vector<8x8x8xf32>
    %5 = arith.mulf %4, %2 : vector<8x8x8xf32>
    %cst = arith.constant dense<0.000000e+00> : vector<8x8xf32>
    %6 = vector.multi_reduction <add>, %5, %cst [2] : vector<8x8x8xf32> to vector<8x8xf32>
    %7 = vector.shape_cast %1 : vector<8x8xf32> to vector<8x8x1xf32>
    %8 = vector.broadcast %7 : vector<8x8x1xf32> to vector<8x8x8xf32>
    %9 = arith.mulf %8, %2 : vector<8x8x8xf32>
    %cst_6 = arith.constant dense<0.000000e+00> : vector<8x8xf32>
    %10 = vector.multi_reduction <add>, %9, %cst_6 [1] : vector<8x8x8xf32> to vector<8x8xf32>
    %11 = tpu.transpose %10, [1, 0] : vector<8x8xf32> -> vector<8x8xf32>
    %12 = arith.mulf %6, %11 : vector<8x8xf32>
    %13 = vector.extract_strided_slice %2 {offsets = [0, 0, 0], sizes = [8, 8, 1], strides = [1, 1, 1]} : vector<8x8x8xf32> to vector<8x8x1xf32>
    %14 = vector.shape_cast %13 : vector<8x8x1xf32> to vector<8x8xf32>
    %c0_7 = arith.constant 0 : index
    %c0_8 = arith.constant 0 : index
    %15 = vector.load %arg4[%c0_7, %c0_8] : memref<8x16xf32, #tpu.memory_space<vmem>>, vector<8x8xf32>
    tpu.vector_store %arg4[%c0_7, %c0_8], %12 {strides = array<i32>} : memref<8x16xf32, #tpu.memory_space<vmem>>, vector<8x8xf32>,
    %c0_9 = arith.constant 0 : index
    %c8 = arith.constant 8 : index
    %16 = vector.load %arg4[%c0_9, %c8] : memref<8x16xf32, #tpu.memory_space<vmem>>, vector<8x8xf32>
    tpu.vector_store %arg4[%c0_9, %c8], %14 {strides = array<i32>} : memref<8x16xf32, #tpu.memory_space<vmem>>, vector<8x8xf32>,
    return
  }
  func.func @transform_0(%arg0: i32) -> (i32, i32) {
    %c0_i32 = arith.constant 0 : i32
    %c0_i32_0 = arith.constant 0 : i32
    %c0_i32_1 = arith.constant 0 : i32
    return %c0_i32, %c0_i32_0 : i32, i32
  }
  func.func @transform_1(%arg0: i32) -> (i32, i32) {
    %c0_i32 = arith.constant 0 : i32
    %c0_i32_0 = arith.constant 0 : i32
    %c0_i32_1 = arith.constant 0 : i32
    return %c0_i32, %c0_i32_0 : i32, i32
  }
  func.func @transform_2(%arg0: i32) -> (i32, i32, i32) {
    %c0_i32 = arith.constant 0 : i32
    %c0_i32_0 = arith.constant 0 : i32
    %c0_i32_1 = arith.constant 0 : i32
    %c0_i32_2 = arith.constant 0 : i32
    return %c0_i32, %c0_i32_0, %c0_i32_1 : i32, i32, i32
  }
  func.func @transform_3(%arg0: i32) -> (i32, i32) {
    %c0_i32 = arith.constant 0 : i32
    %c0_i32_0 = arith.constant 0 : i32
    %c0_i32_1 = arith.constant 0 : i32
    return %c0_i32, %c0_i32_0 : i32, i32
  }
}

</mosaic_0001>

<bundles_post_ra>
// kernel: tpu_custom_call.1
= control target key start
LH: loop header
LB: loop body
LE: loop exit
PB: predicated region body
PF: predicated region fallthrough
CT: control target
= control target key end

     0   :  { %8 = vsyncpa [#allocation3], 0  ;;  %s870_s0 = inlined_call_operand.hbm [shape: f32[8,8], index: 0, kind: input, shape index: {}]   ;;  %s871_s1 = inlined_call_operand.hbm [shape: f32[8,8], index: 1, kind: input, shape index: {}]   ;;  %s872_s2 = inlined_call_operand.hbm [shape: f32[8,8,8], index: 2, kind: input, shape index: {}]   ;;  %s873_s3 = inlined_call_operand.hbm [shape: f32[8,16], index: 3, kind: output, shape index: {}]  }
   0x1   :  { %9 = vsyncpa [#allocation6], 0 }
   0x2   :  { %10 = vsyncpa [#allocation4], 0  ;;  %s697_s12 = smov [#allocation5]   ;;  %s698_s14 = smov [#allocation2]  }
   0x3   :  { %s27_s13 = sshll.u32 %s697_s12, 4  ;;  %s17_s15 = sshll.u32 %s698_s14, 4  ;;  %s28_s13 = int_to_ptr.vmem [resolvable:$true] %s27_s13  ;;  %s18_s15 = int_to_ptr.vmem [resolvable:$true] %s17_s15 }
   0x4   :  { %s619_s16 = scalar_lea.vmem %s28_s13, 128  ;;  %p624_p1 = scmp.lt.s32.totalorder %s28_s13, %s28_s13 }
   0x5   :  { %p620_p0 = scmp.ne.s32.totalorder %s28_s13, %s619_s16  ;;  %p625_p2 = scmp.lt.s32.totalorder %s619_s16, %s619_s16 }
   0x7   :  { %p626_p3 = por %p625_p2, %p624_p1 }
   0x9   :  { %p627_p4 = pnand %p626_p3, %p620_p0 }
   0xb   :  { %630 = shalt.err (!%p627_p4)
}
   0xc   :  { %30 = dma.hbm_to_vmem [thread:$0]  %s871_s1, 128, %s28_s13, [#allocation6]  }
   0xd   :  { %s639_s19 = scalar_lea.vmem %s18_s15, 128  ;;  %p644_p6 = scmp.lt.s32.totalorder %s18_s15, %s18_s15 }
   0xe   :  { %p640_p5 = scmp.ne.s32.totalorder %s18_s15, %s639_s19  ;;  %p645_p7 = scmp.lt.s32.totalorder %s639_s19, %s639_s19 }
  0x10   :  { %p646_p8 = por %p645_p7, %p644_p6 }
  0x12   :  { %p647_p9 = pnand %p646_p8, %p640_p5 }
  0x14   :  { %650 = shalt.err (!%p647_p9)
}
  0x15   :  { %20 = dma.hbm_to_vmem [thread:$0]  %s870_s0, 128, %s18_s15, [#allocation3]  }
  0x16   :  { %s699_s22 = smov [#allocation7]  }
  0x17   :  { %s36_s23 = sshll.u32 %s699_s22, 4  ;;  %s37_s23 = int_to_ptr.vmem [resolvable:$true] %s36_s23 }
  0x18   :  { %s659_s24 = scalar_lea.vmem %s37_s23, 1024  ;;  %p664_p11 = scmp.lt.s32.totalorder %s37_s23, %s37_s23 }
  0x19   :  { %p660_p10 = scmp.ne.s32.totalorder %s37_s23, %s659_s24  ;;  %p665_p12 = scmp.lt.s32.totalorder %s659_s24, %s659_s24 }
  0x1b   :  { %p666_p13 = por %p665_p12, %p664_p11 }
  0x1d   :  { %p667_p0 = pnand %p666_p13, %p660_p10 }
  0x1f   :  { %670 = shalt.err (!%p667_p0)
}
  0x20   :  { %s700_s1 = smov 128   ;;  %s701_s25 = smov 8  }
  0x21   :  { %42 = dma.hbm_to_vmem [thread:$0]  %s872_s2, 1024, %s37_s23, [#allocation6], %s700_s1, %s700_s1, %s701_s25  }
  0x22   :  { %691 = dma.done.wait [#allocation3], 128  }
  0x23   :  { %692 = vsyncadd [#allocation3], 4294967168 }
  0x24   :  { %693 = dma.done.wait [#allocation6], 1152  }
  0x25   :  { %694 = vsyncadd [#allocation6], 4294966144  ;;  %v67_v0 = vlaneseq  ;;  %v53_v6 = vld [vmem:[#allocation5] sm:$0xff]  ;;  %v702_v19 = vmov 1966171168   ;;  %v52_v23 = vld [vmem:[#allocation2] sm:$0xff] }
  0x26   :  { %v65_v20 = vunpack.c.l.s4 %v702_v19  ;;  %v764_v28 = vld [vmem:[#allocation7 + $0x8] sm:$0xff]  ;;  %vm160_vm0 = vcmask 64512   ;;  %v63_v33 = vcombine.high %v52_v23, %v52_v23  ;;  %v769_v35 = vld [vmem:[#allocation7] sm:$0xff]  ;;  %v773_v40 = vld [vmem:[#allocation7 + $0x10] sm:$0xff]  ;;  %vm313_vm1 = vcmask 1041409   ;;  %s704_s0 = smov [#allocation8]  }
  0x27   :  { %v735_v1 = vshrl.u32 %v67_v0, 7  ;;  %v778_v45 = vld [vmem:[#allocation7 + $0x18] sm:$0xff]  ;;  %v783_v49 = vld [vmem:[#allocation7 + $0x20] sm:$0xff]  ;;  %v788_v56 = vld [vmem:[#allocation7 + $0x28] sm:$0xff]  ;;  %vm315_vm2 = vcmask 1042434   ;;  %vm317_vm3 = vcmask 1043459  }
  0x28   :  { %v66_v21 = vunpack.c.0.s8 %v65_v20  ;;  %v793_v61 = vld [vmem:[#allocation7 + $0x30] sm:$0xff]  ;;  %vm319_vm4 = vcmask 1044484   ;;  %vm321_vm5 = vcmask 1045509   ;;  %vm323_vm6 = vcmask 1046534   ;;  %s589_s2 = sshll.u32 %s704_s0, 4  ;;  %s590_s2 = int_to_ptr.vmem [resolvable:$true] %s589_s2 }
  0x29   :  { %v201_v2 = vsub.s32 2, %v735_v1  ;;  %v739_v3 = vsub.s32 0, %v735_v1  ;;  %v208_v4 = vsub.s32 3, %v735_v1  ;;  %v194_v5 = vsub.s32 1, %v735_v1  ;;  %s671_s28 = scalar_lea.vmem %s590_s2, 128  ;;  %p676_p2 = scmp.lt.s32.totalorder %s590_s2, %s590_s2 }
  0x2a   :  { %v222_v11 = vsub.s32 5, %v735_v1  ;;  %v215_v12 = vsub.s32 4, %v735_v1  ;;  %v236_v15 = vsub.s32 7, %v735_v1  ;;  %v229_v16 = vsub.s32 6, %v735_v1  ;;  %p672_p1 = scmp.ne.s32.totalorder %s590_s2, %s671_s28  ;;  %p677_p3 = scmp.lt.s32.totalorder %s671_s28, %s671_s28 }
  0x2b   :  { %v202_v7 = vrot.slane %v53_v6, %v201_v2  ;;  %v188_v8 = vrot.slane %v53_v6, %v739_v3  ;;  %v209_v9 = vrot.slane %v53_v6, %v208_v4  ;;  %v195_v10 = vrot.slane %v53_v6, %v194_v5 }
  0x2c   :  { %v223_v13 = vrot.slane %v53_v6, %v222_v11  ;;  %v216_v14 = vrot.slane %v53_v6, %v215_v12  ;;  %v237_v17 = vrot.slane %v53_v6, %v236_v15  ;;  %v230_v18 = vrot.slane %v53_v6, %v229_v16  ;;  %p678_p4 = por %p677_p3, %p676_p2 }
  0x2d   :  { %204 = vbcast.lane.b32.xlu1 %v202_v7, 256  ;;  %190 = vbcast.lane.b32.xlu0 %v188_v8, 256  ;;  %v69_v22 = vsub.s32 %v66_v21, %v735_v1  ;;  %v798_v7 = vld [vmem:[#allocation7 + $0x38] sm:$0xff]  ;;  %vm325_vm7 = vcmask 1047559   ;;  %vm581_vm8 = vcmask 130112  }
  0x2e   :  { %p679_p5 = pnand %p678_p4, %p672_p1 }
  0x2f   :  { %v70_v24 = vrot.slane %v52_v23, %v69_v22  ;;  %v77_v39 = vrot.slane %v63_v33, %v69_v22 }
  0x31   :  { %211 = vbcast.lane.b32.xlu1 %v209_v9, 256  ;;  %197 = vbcast.lane.b32.xlu0 %v195_v10, 256  ;;  %v78_v25 = vcombine.high %v70_v24, %v70_v24  ;;  %v86_v29 = vrot.slane %v70_v24, %v69_v22  ;;  %v93_v44 = vrot.slane %v77_v39, %v69_v22 }
  0x32   :  { %v79_v50 = vcombine.high %v77_v39, %v77_v39 }
  0x33   :  { %v100_v26 = vrot.slane %v78_v25, %v69_v22  ;;  %v115_v31 = vrot.slane %v86_v29, %v739_v3  ;;  %v108_v32 = vcombine.high %v86_v29, %v86_v29  ;;  %v131_v48 = vrot.slane %v93_v44, %v739_v3 }
  0x34   :  { %v109_v53 = vcombine.high %v93_v44, %v93_v44  ;;  %v107_v54 = vrot.slane %v79_v50, %v69_v22 }
  0x35   :  { %225 = vbcast.lane.b32.xlu1 %v223_v13, 256  ;;  %218 = vbcast.lane.b32.xlu0 %v216_v14, 256  ;;  %v119_v27 = vrot.slane %v100_v26, %v739_v3  ;;  %v152_v36 = vmul.f32 %v115_v31, %v769_v35  ;;  %v123_v37 = vrot.slane %v108_v32, %v739_v3 }
  0x36   :  { %v110_v38 = vcombine.high %v100_v26, %v100_v26  ;;  %v156_v52 = vmul.f32 %v131_v48, %v783_v49  ;;  %v135_v55 = vrot.slane %v107_v54, %v739_v3  ;;  %v139_v58 = vrot.slane %v109_v53, %v739_v3 }
  0x37   :  { %v153_v30 = vmul.f32 %v119_v27, %v764_v28  ;;  %v161_v41 = vsel %vm160_vm0, %v152_v36, 0.0  ;;  %v154_v42 = vmul.f32 %v123_v37, %v773_v40  ;;  %v111_v59 = vcombine.high %v107_v54, %v107_v54 }
  0x38   :  { %v127_v43 = vrot.slane %v110_v38, %v739_v3  ;;  %v173_v57 = vsel %vm160_vm0, %v156_v52, 0.0  ;;  %v157_v60 = vmul.f32 %v135_v55, %v788_v56  ;;  %v158_v63 = vmul.f32 %v139_v58, %v793_v61 }
  0x39   :  { %239 = vbcast.lane.b32.xlu1 %v237_v17, 256  ;;  %232 = vbcast.lane.b32.xlu0 %v230_v18, 256  ;;  %v164_v34 = vsel %vm160_vm0, %v153_v30, 0.0  ;;  %v167_v46 = vsel %vm160_vm0, %v154_v42, 0.0  ;;  %v143_v6 = vrot.slane %v111_v59, %v739_v3 }
  0x3a   :  { %v155_v47 = vmul.f32 %v127_v43, %v778_v45  ;;  %v176_v62 = vsel %vm160_vm0, %v157_v60, 0.0  ;;  %v179_v8 = vsel %vm160_vm0, %v158_v63, 0.0 }
  0x3b   :  { %v159_v9 = vmul.f32 %v143_v6, %v798_v7 }
  0x3c   :  { %v170_v51 = vsel %vm160_vm0, %v155_v47, 0.0 }
  0x3d   :  { %v182_v10 = vsel %vm160_vm0, %v159_v9, 0.0 }
  0x58   :  { %165 = vadd.xlane.f32.xlu0 %v164_v34 }
  0x5d   :  { %162 = vadd.xlane.f32.xlu1 %v161_v41 }
  0x61   :  { %168 = vadd.xlane.f32.xlu1 %v167_v46 }
  0x65   :  { %171 = vadd.xlane.f32.xlu1 %v170_v51 }
  0x69   :  { %174 = vadd.xlane.f32.xlu1 %v173_v57 }
  0x6d   :  { %177 = vadd.xlane.f32.xlu1 %v176_v62 }
  0x71   :  { %180 = vadd.xlane.f32.xlu1 %v179_v8 }
  0x75   :  { %183 = vadd.xlane.f32.xlu1 %v182_v10 }
  0x9f   :  { %v205_v13 = vpop.permute.xlu1 %204  ;;  %v191_v14 = vpop.permute.xlu0 %190 }
  0xa0   :  { %v243_v17 = vmul.f32 %v205_v13, %v773_v40  ;;  %v241_v18 = vmul.f32 %v191_v14, %v769_v35 }
  0xa2   :  { %v263_v19 = vsel %vm160_vm0, %v243_v17, 0.0  ;;  %v249_v20 = vsel %vm160_vm0, %v241_v18, 0.0 }
  0xa3   :  { %v264_v21 = vrot.slane %v263_v19, 4  ;;  %v250_v22 = vrot.slane %v249_v20, 4  ;;  %v212_v23 = vpop.permute.xlu1 %211  ;;  %v198_v24 = vpop.permute.xlu0 %197 }
  0xa4   :  { %v244_v25 = vmul.f32 %v212_v23, %v778_v45  ;;  %v242_v26 = vmul.f32 %v198_v24, %v764_v28 }
  0xa5   :  { %v265_v27 = vadd.f32 %v264_v21, %v263_v19  ;;  %v251_v29 = vadd.f32 %v250_v22, %v249_v20 }
  0xa6   :  { %v270_v30 = vsel %vm160_vm0, %v244_v25, 0.0  ;;  %v256_v31 = vsel %vm160_vm0, %v242_v26, 0.0 }
  0xa7   :  { %v266_v32 = vrot.slane %v265_v27, 2  ;;  %v252_v33 = vrot.slane %v251_v29, 2  ;;  %v271_v34 = vrot.slane %v270_v30, 4  ;;  %v257_v36 = vrot.slane %v256_v31, 4  ;;  %v226_v37 = vpop.permute.xlu1 %225  ;;  %v219_v38 = vpop.permute.xlu0 %218 }
  0xa8   :  { %v246_v39 = vmul.f32 %v226_v37, %v788_v56  ;;  %v245_v41 = vmul.f32 %v219_v38, %v783_v49 }
  0xa9   :  { %v267_v42 = vadd.f32 %v266_v32, %v265_v27  ;;  %v253_v43 = vadd.f32 %v252_v33, %v251_v29  ;;  %v272_v44 = vadd.f32 %v271_v34, %v270_v30  ;;  %v258_v46 = vadd.f32 %v257_v36, %v256_v31 }
  0xaa   :  { %v284_v47 = vsel %vm160_vm0, %v246_v39, 0.0  ;;  %v277_v48 = vsel %vm160_vm0, %v245_v41, 0.0 }
  0xab   :  { %v273_v50 = vrot.slane %v272_v44, 2  ;;  %v259_v51 = vrot.slane %v258_v46, 2  ;;  %v240_v52 = vpop.permute.xlu1 %239  ;;  %v233_v53 = vpop.permute.xlu0 %232  ;;  %v285_v54 = vrot.slane %v284_v47, 4  ;;  %v278_v55 = vrot.slane %v277_v48, 4 }
  0xac   :  { %v248_v57 = vmul.f32 %v240_v52, %v798_v7  ;;  %v247_v58 = vmul.f32 %v233_v53, %v793_v61  ;;  %v268_v59 = vrot.slane %v267_v42, 1  ;;  %v254_v60 = vrot.slane %v253_v43, 1 }
  0xad   :  { %v274_v62 = vadd.f32 %v273_v50, %v272_v44  ;;  %v260_v63 = vadd.f32 %v259_v51, %v258_v46  ;;  %v286_v6 = vadd.f32 %v285_v54, %v284_v47  ;;  %v279_v8 = vadd.f32 %v278_v55, %v277_v48 }
  0xae   :  { %v298_v9 = vsel %vm160_vm0, %v248_v57, 0.0  ;;  %v291_v10 = vsel %vm160_vm0, %v247_v58, 0.0  ;;  %v255_v21 = vadd.f32 %v254_v60, %v253_v43  ;;  %v269_v25 = vadd.f32 %v268_v59, %v267_v42 }
  0xaf   :  { %v275_v13 = vrot.slane %v274_v62, 1  ;;  %v261_v14 = vrot.slane %v260_v63, 1  ;;  %v299_v17 = vrot.slane %v298_v9, 4  ;;  %v292_v18 = vrot.slane %v291_v10, 4 }
  0xb0   :  { %v287_v19 = vrot.slane %v286_v6, 2  ;;  %v280_v20 = vrot.slane %v279_v8, 2  ;;  %v703_v53 = vmov 0  }
  0xb1   :  { %v262_v22 = vadd.f32 %v261_v14, %v260_v63  ;;  %v300_v23 = vadd.f32 %v299_v17, %v298_v9  ;;  %v293_v24 = vadd.f32 %v292_v18, %v291_v10  ;;  %v276_v29 = vadd.f32 %v275_v13, %v274_v62  ;;  %608 = vset.pattern.permute.xlu1 %v703_v53 }
  0xb2   :  { %v288_v26 = vadd.f32 %v287_v19, %v286_v6  ;;  %v281_v27 = vadd.f32 %v280_v20, %v279_v8 }
  0xb3   :  { %v314_v30 = vsel %vm313_vm1, %v262_v22, %v255_v21  ;;  %v301_v31 = vrot.slane %v300_v23, 2  ;;  %v294_v32 = vrot.slane %v293_v24, 2 }
  0xb4   :  { %v289_v33 = vrot.slane %v288_v26, 1  ;;  %v282_v34 = vrot.slane %v281_v27, 1  ;;  %v316_v36 = vsel %vm315_vm2, %v269_v25, %v314_v30 }
  0xb5   :  { %v302_v37 = vadd.f32 %v301_v31, %v300_v23  ;;  %v295_v38 = vadd.f32 %v294_v32, %v293_v24  ;;  %v318_v39 = vsel %vm317_vm3, %v276_v29, %v316_v36 }
  0xb6   :  { %v290_v41 = vadd.f32 %v289_v33, %v288_v26  ;;  %v283_v43 = vadd.f32 %v282_v34, %v281_v27  ;;  %v466_v26 = vand.u32 127, %v67_v0 }
  0xb7   :  { %v296_v42 = vrot.slane %v295_v38, 1  ;;  %v303_v44 = vrot.slane %v302_v37, 1 }
  0xb8   :  { %v320_v46 = vsel %vm319_vm4, %v283_v43, %v318_v39  ;;  %v540_v30 = vadd.s32 4294967288, %v466_v26  ;;  %v469_v36 = vsub.s32 %v466_v26, %v735_v1 }
  0xb9   :  { %v297_v47 = vadd.f32 %v296_v42, %v295_v38  ;;  %v304_v48 = vadd.f32 %v303_v44, %v302_v37  ;;  %v322_v50 = vsel %vm321_vm5, %v290_v41, %v320_v46 }
  0xba   :  { %v543_v32 = vsub.s32 %v540_v30, %v735_v1 }
  0xbb   :  { %v324_v51 = vsel %vm323_vm6, %v297_v47, %v322_v50 }
  0xbc   :  { %v326_v52 = vsel %vm325_vm7, %v304_v48, %v324_v51 }
  0xbd   :  { %328 = vxpose.xlu0.b32.start.end [1/1] (short) (narrow) %v326_v52, 8 }
  0xe1   :  { %v166_v54 = vpop.xlane.xlu0 %165 }
  0xe6   :  { %609 = vset.pattern.permute.xlu0 %v703_v53 }
 0x139   :  { %v344_v55 = vpop.trf.xlu0 }
 0x13a   :  { %v371_v57 = vrot.slane %v344_v55, %v194_v5  ;;  %v364_v58 = vrot.slane %v344_v55, %v739_v3  ;;  %v413_v59 = vrot.slane %v344_v55, %v236_v15  ;;  %v378_v60 = vrot.slane %v344_v55, %v201_v2 }
 0x13b   :  { %v385_v62 = vrot.slane %v344_v55, %v208_v4  ;;  %v392_v5 = vrot.slane %v344_v55, %v215_v12  ;;  %v399_v3 = vrot.slane %v344_v55, %v222_v11  ;;  %v406_v2 = vrot.slane %v344_v55, %v229_v16  ;;  %v163_v4 = vpop.xlane.xlu1 %162 }
 0x13c   :  { %373 = vbcast.lane.b32.xlu0 %v371_v57, 256  ;;  %366 = vbcast.lane.b32.xlu1 %v364_v58, 256 }
 0x13f   :  { %v169_v15 = vpop.xlane.xlu1 %168 }
 0x140   :  { %415 = vbcast.lane.b32.xlu0 %v413_v59, 256  ;;  %380 = vbcast.lane.b32.xlu1 %v378_v60, 256 }
 0x143   :  { %v172_v12 = vpop.xlane.xlu1 %171 }
 0x144   :  { %387 = vbcast.lane.b32.xlu1 %v385_v62, 256  ;;  %520 = vperm.xlu0 %609, %v764_v28  }
 0x147   :  { %v175_v28 = vpop.xlane.xlu1 %174 }
 0x148   :  { %394 = vbcast.lane.b32.xlu1 %v392_v5, 256  ;;  %523 = vperm.xlu0 %609, %v773_v40  }
 0x14b   :  { %v178_v63 = vpop.xlane.xlu1 %177 }
 0x14c   :  { %401 = vbcast.lane.b32.xlu1 %v399_v3, 256  ;;  %526 = vperm.xlu0 %609, %v778_v45  }
 0x14f   :  { %v181_v40 = vpop.xlane.xlu1 %180 }
 0x150   :  { %408 = vbcast.lane.b32.xlu1 %v406_v2, 256  ;;  %529 = vperm.xlu0 %609, %v783_v49  }
 0x153   :  { %v184_v6 = vpop.xlane.xlu1 %183 }
 0x154   :  { %517 = vperm.xlu1 %608, %v769_v35  }
 0x1ae   :  { %v374_v8 = vpop.permute.xlu0 %373  ;;  %v367_v11 = vpop.permute.xlu1 %366 }
 0x1af   :  { %v426_v9 = vmul.f32 %v374_v8, %v166_v54  ;;  %v425_v10 = vmul.f32 %v367_v11, %v163_v4 }
 0x1b1   :  { %445 = vperm.xlu0 %609, %v426_v9   ;;  %442 = vperm.xlu1 %608, %v425_v10  }
 0x1b2   :  { %v381_v45 = vpop.permute.xlu1 %380  ;;  %v416_v21 = vpop.permute.xlu0 %415 }
 0x1b3   :  { %v427_v16 = vmul.f32 %v381_v45, %v169_v15  ;;  %v432_v22 = vmul.f32 %v416_v21, %v184_v6 }
 0x1b5   :  { %532 = vperm.xlu0 %609, %v788_v56   ;;  %448 = vperm.xlu1 %608, %v427_v16  }
 0x1b6   :  { %v388_v49 = vpop.permute.xlu1 %387 }
 0x1b7   :  { %v428_v35 = vmul.f32 %v388_v49, %v172_v12 }
 0x1b9   :  { %535 = vperm.xlu0 %609, %v793_v61   ;;  %451 = vperm.xlu1 %608, %v428_v35  }
 0x1ba   :  { %v395_v13 = vpop.permute.xlu1 %394 }
 0x1bb   :  { %v429_v14 = vmul.f32 %v395_v13, %v175_v28 }
 0x1bd   :  { %454 = vperm.xlu1 %608, %v429_v14  }
 0x1be   :  { %v402_v17 = vpop.permute.xlu1 %401 }
 0x1bf   :  { %v430_v18 = vmul.f32 %v402_v17, %v178_v63  ;;  %v521_v56 = vpop.permute.xlu0 %520 }
 0x1c0   :  { %v548_v37 = vrot.slane %v521_v56, %v543_v32 }
 0x1c1   :  { %457 = vperm.xlu1 %608, %v430_v18  }
 0x1c2   :  { %v409_v19 = vpop.permute.xlu1 %408 }
 0x1c3   :  { %v431_v20 = vmul.f32 %v409_v19, %v181_v40  ;;  %v524_v23 = vpop.permute.xlu0 %523 }
 0x1c4   :  { %v552_v42 = vrot.slane %v524_v23, %v543_v32 }
 0x1c5   :  { %460 = vperm.xlu1 %608, %v431_v20  }
 0x1c7   :  { %v527_v25 = vpop.permute.xlu0 %526 }
 0x1c8   :  { %v556_v50 = vrot.slane %v527_v25, %v543_v32 }
 0x1c9   :  { %463 = vperm.xlu1 %608, %v432_v22  }
 0x1cb   :  { %v530_v29 = vpop.permute.xlu0 %529 }
 0x1cc   :  { %v560_v58 = vrot.slane %v530_v29, %v543_v32 }
 0x1cd   :  { %538 = vperm.xlu1 %608, %v798_v7  }
 0x1cf   :  { %v518_v24 = vpop.permute.xlu1 %517 }
 0x1d0   :  { %v544_v38 = vrot.slane %v518_v24, %v543_v32 }
 0x1d2   :  { %v573_v0 = vsel %vm313_vm1, %v548_v37, %v544_v38 }
 0x1d3   :  { %v574_v53 = vsel %vm315_vm2, %v552_v42, %v573_v0 }
 0x1d4   :  { %v575_v5 = vsel %vm317_vm3, %v556_v50, %v574_v53 }
 0x1d5   :  { %v576_v28 = vsel %vm319_vm4, %v560_v58, %v575_v5 }
 0x22c   :  { %v443_v61 = vpop.permute.xlu1 %442  ;;  %v446_v33 = vpop.permute.xlu0 %445 }
 0x22d   :  { %v474_v39 = vrot.slane %v446_v33, %v469_v36  ;;  %v470_v41 = vrot.slane %v443_v61, %v469_v36 }
 0x22f   :  { %v499_v51 = vsel %vm313_vm1, %v474_v39, %v470_v41 }
 0x230   :  { %v449_v27 = vpop.permute.xlu1 %448  ;;  %v533_v43 = vpop.permute.xlu0 %532 }
 0x231   :  { %v478_v44 = vrot.slane %v449_v27, %v469_v36  ;;  %v564_v62 = vrot.slane %v533_v43, %v543_v32 }
 0x233   :  { %v500_v1 = vsel %vm315_vm2, %v478_v44, %v499_v51  ;;  %v577_v40 = vsel %vm321_vm5, %v564_v62, %v576_v28 }
 0x234   :  { %v452_v31 = vpop.permute.xlu1 %451  ;;  %v536_v55 = vpop.permute.xlu0 %535 }
 0x235   :  { %v482_v46 = vrot.slane %v452_v31, %v469_v36  ;;  %v568_v4 = vrot.slane %v536_v55, %v543_v32 }
 0x237   :  { %v501_v57 = vsel %vm317_vm3, %v482_v46, %v500_v1  ;;  %v578_v8 = vsel %vm323_vm6, %v568_v4, %v577_v40 }
 0x238   :  { %v455_v34 = vpop.permute.xlu1 %454 }
 0x239   :  { %v486_v47 = vrot.slane %v455_v34, %v469_v36 }
 0x23b   :  { %v502_v59 = vsel %vm319_vm4, %v486_v47, %v501_v57 }
 0x23c   :  { %v458_v7 = vpop.permute.xlu1 %457 }
 0x23d   :  { %v490_v52 = vrot.slane %v458_v7, %v469_v36 }
 0x23f   :  { %v503_v3 = vsel %vm321_vm5, %v490_v52, %v502_v59 }
 0x240   :  { %v461_v48 = vpop.permute.xlu1 %460 }
 0x241   :  { %v494_v54 = vrot.slane %v461_v48, %v469_v36 }
 0x243   :  { %v504_v15 = vsel %vm323_vm6, %v494_v54, %v503_v3 }
 0x244   :  { %v464_v60 = vpop.permute.xlu1 %463 }
 0x245   :  { %v498_v2 = vrot.slane %v464_v60, %v469_v36 }
 0x247   :  { %v505_v12 = vsel %vm325_vm7, %v498_v2, %v504_v15 }
 0x248   :  { %507 = vst.msk [vmem:[#allocation8] sm:$0xff] %vm160_vm0, %v505_v12  ;;  %v539_v63 = vpop.permute.xlu1 %538 }
 0x249   :  { %v572_v6 = vrot.slane %v539_v63, %v543_v32 }
 0x24b   :  { %v579_v11 = vsel %vm325_vm7, %v572_v6, %v578_v8 }
 0x24c   :  { %582 = vst.msk [vmem:[#allocation8] sm:$0xff] %vm581_vm8, %v579_v11 }
 0x24d   :  { %682 = shalt.err (!%p679_p5)
}
 0x24e   :  { %592 = dma.vmem_to_hbm [thread:$0]  %s590_s2, 128, %s873_s3, [#allocation4]  }
 0x24f   :  { %695 = dma.done.wait [#allocation4], 128  }
 0x250   :  { %696 = vsyncadd [#allocation4], 4294967168 }
 0x251   :  { %596 = vsyncpa [#allocation3], 1 }
 0x252   :  { %597 = vsyncpa [#allocation6], 1 }
 0x253   :  { %598 = vsyncpa [#allocation4], 1 }

</bundles_post_ra>
